<compile_context>
chip_gen: v6e
topology: v6e:2x2x1
jax: 0.10.0
libtpu: 0.0.40
codegen_flags: <defaults>
</compile_context>

<pallas_src>
import functools

import jax
import jax.numpy as jnp
from jax import lax
from jax.experimental import pallas as pl
from jax.experimental.pallas import tpu as pltpu


def _fcnet2d_kernel(*refs, num_layers, n_slice, tile_b):
    """One batch-tile of the FCNet2d forward, fully resident in VMEM/vregs.

    refs (in order):
      x(tile_b*n_slice, in_ch)                       VMEM input tile
      fc0_w, fc0_b, ..., fc{L-1}_w, fc{L-1}_b        resident weights (w: compute dtype, b: f32)
      w_row(1, tile_b*n_slice)                       sfc_w tiled tile_b times (f32)
      sfc_b(1, 1)                                    SMEM scalar
      out_w(c_last, out_ch), out_b(1, out_ch)
      o(tile_b, out_ch)                              output tile
    """
    x_ref, *rest = refs
    fc_refs = rest[: 2 * num_layers]
    w_row_ref, sfc_b_ref, out_w_ref, out_b_ref, o_ref = rest[2 * num_layers:]

    # ---- self._fcs: widening Linear + LeakyReLU(0.01). Dropout == identity in eval mode. ----
    h = x_ref[...].astype(jnp.float32)                              # (TB*S, C_i)
    for i in range(num_layers):
        w = fc_refs[2 * i][...]                                     # (C_i, 2*C_i) compute dtype
        b = fc_refs[2 * i + 1][...].astype(jnp.float32)             # (1, 2*C_i)
        h = jnp.dot(h.astype(w.dtype), w, preferred_element_type=jnp.float32) + b
        h = jnp.where(h > 0, h, jnp.float32(0.01) * h)              # LeakyReLU(0.01), f32 VPU

    # ---- self._s_fc: permute -> Linear(n_slice, 1) -> permute, done without any transpose.
    # Per-tile block-diagonal selector built from iota masks (no O(B^2) HBM selector):
    #   sel[b, b*S + s] = sfc_w[s]  =>  hs = sel @ h  ==  weighted slice reduction per batch. ----
    tbs = tile_b * n_slice
    rows = lax.broadcasted_iota(jnp.int32, (tile_b, tbs), 0)
    cols = lax.broadcasted_iota(jnp.int32, (tile_b, tbs), 1)
    in_blk = (cols >= rows * n_slice) & (cols < (rows + 1) * n_slice)
    sel = jnp.where(in_blk, w_row_ref[...].astype(jnp.float32), jnp.float32(0.0))
    hs = jnp.dot(sel, h, preferred_element_type=jnp.float32) + sfc_b_ref[0, 0]
    # TODO(synk): StandardFC2d's default post-Linear activation for _s_fc is assumed to be ReLU.
    hs = jnp.maximum(hs, jnp.float32(0.0))                          # (TB, C_last)

    # ---- self._fcs_out: plain Linear on the feature dim. ----
    out_w = out_w_ref[...]
    out = jnp.dot(hs.astype(out_w.dtype), out_w, preferred_element_type=jnp.float32)
    out = out + out_b_ref[...].astype(jnp.float32)
    o_ref[...] = out.astype(o_ref.dtype)                            # (TB, out_ch)


def _pick_tile_b(batch, n_slice, c_last):
    """Largest batch tile whose widest f32 activation block fits a small VMEM budget.

    Rows of the x block must be sublane-aligned (tile_b*n_slice % 8 == 0) unless the tile is
    the whole batch; prefers >= 2 grid steps so v7x megacore has work for both TensorCores.
    """
    budget = 2 << 20  # f32 bytes for the widest activation block
    cands = [tb for tb in range(1, batch + 1)
             if batch % tb == 0 and ((tb * n_slice) % 8 == 0 or tb == batch)]
    fitting = [tb for tb in cands if tb * n_slice * c_last * 4 <= budget] or cands[:1]
    multi = [tb for tb in fitting if tb < batch]
    pool = multi if multi else fitting
    return max(pool)


def fcnet2d_forward(params, x, num_layers, compute_dtype=jnp.bfloat16):
    """x: (B, n_slice, in_ch) -> (B, 1, out_ch). Inference mode (dropout = identity)."""
    B, S, C = x.shape
    c_last, out_ch = params["out_w"].shape

    tb = _pick_tile_b(B, S, c_last)
    nb = B // tb
    tbs = tb * S

    # Flatten (B, S, C) -> (B*S, C); Linear acts on the last dim, matching PyTorch.
    h0 = x.reshape(B * S, C)
    # sfc_w tiled tb times along lanes: w_row[0, b*S + s] = sfc_w[s].  O(tb*S) bytes, not O(B^2).
    w_row = jnp.tile(params["sfc_w"].reshape(1, S).astype(jnp.float32), (1, tb))

    def full_block(a):
        return pl.BlockSpec(a.shape, lambda i, _nd=a.ndim: (0,) * _nd)

    args = [h0]
    in_specs = [pl.BlockSpec((tbs, C), lambda i: (i, 0))]
    for i in range(num_layers):
        w = params[f"fc{i}_w"].astype(compute_dtype)       # matmul operand: bf16 (MXU fast path)
        b = params[f"fc{i}_b"].reshape(1, -1).astype(jnp.float32)
        args += [w, b]
        in_specs += [full_block(w), full_block(b)]
    sfc_b = params["sfc_b"].reshape(1, 1).astype(jnp.float32)
    out_w = params["out_w"].astype(compute_dtype)
    out_b = params["out_b"].reshape(1, -1).astype(jnp.float32)
    args += [w_row, sfc_b, out_w, out_b]
    in_specs += [
        full_block(w_row),
        pl.BlockSpec(memory_space=pltpu.MemorySpace.SMEM),   # true scalar -> SMEM, no VMEM tile
        full_block(out_w),
        full_block(out_b),
    ]

    # VMEM budget: resident weights + double-buffered x/out blocks + activation headroom.
    weight_bytes = sum(int(a.size) * a.dtype.itemsize for a in args[1:])
    x_blk = tbs * C * x.dtype.itemsize
    act_blk = tbs * c_last * 4
    out_blk = tb * out_ch * 4
    vmem_limit = int(min(max(weight_bytes + 2 * x_blk + 2 * out_blk + 4 * act_blk + (1 << 20),
                             4 << 20), 48 << 20))

    flops = sum(2 * B * S * params[f"fc{i}_w"].shape[0] * params[f"fc{i}_w"].shape[1]
                for i in range(num_layers))
    flops += 2 * B * S * c_last + 2 * B * c_last * out_ch
    bytes_accessed = int(x.size) * x.dtype.itemsize + weight_bytes + B * out_ch * x.dtype.itemsize

    kern = functools.partial(_fcnet2d_kernel, num_layers=num_layers, n_slice=S, tile_b=tb)
    out = pl.pallas_call(
        kern,
        grid=(nb,),
        in_specs=in_specs,
        # 3-D output so the per-tile block's trailing dims equal the array's trailing dims
        # (lane/sublane-legal for any tile_b); leading grid dim is squeezed in-kernel.
        out_specs=pl.BlockSpec((None, tb, out_ch), lambda i: (i, 0, 0)),
        out_shape=jax.ShapeDtypeStruct((nb, tb, out_ch), x.dtype),
        compiler_params=pltpu.CompilerParams(
            dimension_semantics=("parallel",),
            vmem_limit_bytes=vmem_limit),
        cost_estimate=pl.CostEstimate(flops=flops, transcendentals=0,
                                      bytes_accessed=bytes_accessed),
    )(*args)
    return out.reshape(B, 1, out_ch)


def init_params(key, in_ch, out_ch, n_slice, num_layers):
    """Deterministic synthetic parameters (shapes mirror the PyTorch module)."""
    params = {}
    keys = jax.random.split(key, 2 * num_layers + 4)
    k_it = iter(keys)
    # _fcs: StandardFC2d(in_ch * 2**i -> in_ch * 2**(i+1)), leaky-relu
    for i in range(num_layers):
        cin, cout = in_ch * 2 ** i, in_ch * 2 ** (i + 1)
        params[f"fc{i}_w"] = 0.1 * jax.random.normal(next(k_it), (cin, cout), jnp.float32)
        params[f"fc{i}_b"] = 0.1 * jax.random.normal(next(k_it), (cout,), jnp.float32)
    # _s_fc inner: StandardFC2d(n_slice -> 1)
    params["sfc_w"] = 0.1 * jax.random.normal(next(k_it), (n_slice, 1), jnp.float32)
    params["sfc_b"] = 0.1 * jax.random.normal(next(k_it), (1,), jnp.float32)
    # _fcs_out: Linear(in_ch * 2**num_layers -> out_ch)
    c_last = in_ch * 2 ** num_layers
    params["out_w"] = 0.1 * jax.random.normal(next(k_it), (c_last, out_ch), jnp.float32)
    params["out_b"] = 0.1 * jax.random.normal(next(k_it), (out_ch,), jnp.float32)
    return params


def _ref_forward(params, x, num_layers, compute_dtype=jnp.bfloat16):
    """Pure-JAX reference of the PyTorch module (eval mode), mirroring the kernel's bf16 matmuls."""
    B, S, _ = x.shape
    h = x.astype(jnp.float32)
    for i in range(num_layers):
        w = params[f"fc{i}_w"].astype(compute_dtype)
        h = jnp.dot(h.astype(compute_dtype), w,
                    preferred_element_type=jnp.float32) + params[f"fc{i}_b"]
        h = jnp.where(h > 0, h, 0.01 * h)
    hp = jnp.transpose(h, (0, 2, 1))                                        # (B, C_last, S)
    hs = jnp.einsum("bcs,so->bco", hp, params["sfc_w"],
                    preferred_element_type=jnp.float32) + params["sfc_b"]   # (B, C_last, 1)
    hs = jnp.maximum(hs, 0.0)
    hs = jnp.transpose(hs, (0, 2, 1))                                       # (B, 1, C_last)
    out_w = params["out_w"].astype(compute_dtype)
    return jnp.dot(hs.astype(compute_dtype), out_w,
                   preferred_element_type=jnp.float32) + params["out_b"]    # (B, 1, out_ch)


if __name__ == "__main__":
    # Small shapes consistent with the module's 3-D input contract.
    B, in_ch, out_ch, n_slice, num_layers = 2, 4, 3, 8, 2

    key = jax.random.PRNGKey(0)
    kx, kp = jax.random.split(key)
    x = jax.random.normal(kx, (B, n_slice, in_ch), dtype=jnp.float32)
    params = init_params(kp, in_ch, out_ch, n_slice, num_layers)

    fwd = jax.jit(functools.partial(fcnet2d_forward, num_layers=num_layers))
    y = jax.block_until_ready(fwd(params, x))

    assert y.shape == (B, 1, out_ch), y.shape
    assert bool(jnp.all(jnp.isfinite(y)))

    y_ref = _ref_forward(params, x, num_layers)
    assert jnp.allclose(y, y_ref, atol=2e-3, rtol=2e-3), float(jnp.max(jnp.abs(y - y_ref)))

    print("KERNEL_OK")
</pallas_src>

<mosaic_0001>
module attributes {stable_mosaic.version = 11 : i64} {
  func.func @_fcnet2d_kernel(%arg0: i32, %arg1: memref<8x4xf32, #tpu.memory_space<vmem>>, %arg2: memref<4x8xbf16, #tpu.memory_space<vmem>>, %arg3: memref<1x8xf32, #tpu.memory_space<vmem>>, %arg4: memref<8x16xbf16, #tpu.memory_space<vmem>>, %arg5: memref<1x16xf32, #tpu.memory_space<vmem>>, %arg6: memref<1x8xf32, #tpu.memory_space<vmem>>, %arg7: memref<1x1xf32, #tpu.memory_space<smem>>, %arg8: memref<16x3xbf16, #tpu.memory_space<vmem>>, %arg9: memref<1x3xf32, #tpu.memory_space<vmem>>, %arg10: memref<1x1x3xf32, #tpu.memory_space<vmem>>) attributes {dimension_semantics = [#tpu.dimension_semantics<parallel>], iteration_bounds = array<i64: 2>, scalar_prefetch = 0 : i64, scratch_operands = 0 : i64, tpu.core_type = #tpu.core_type<tc>, window_params = [{transform_indices = @transform_0, window_bounds = array<i64: 8, 4>}, {pipeline_mode = #tpu.pipeline_mode<synchronous>, transform_indices = @transform_1, window_bounds = array<i64: 4, 8>}, {pipeline_mode = #tpu.pipeline_mode<synchronous>, transform_indices = @transform_2, window_bounds = array<i64: 1, 8>}, {pipeline_mode = #tpu.pipeline_mode<synchronous>, transform_indices = @transform_3, window_bounds = array<i64: 8, 16>}, {pipeline_mode = #tpu.pipeline_mode<synchronous>, transform_indices = @transform_4, window_bounds = array<i64: 1, 16>}, {pipeline_mode = #tpu.pipeline_mode<synchronous>, transform_indices = @transform_5, window_bounds = array<i64: 1, 8>}, {transform_indices = @transform_6, window_bounds = array<i64: 1, 1>}, {pipeline_mode = #tpu.pipeline_mode<synchronous>, transform_indices = @transform_7, window_bounds = array<i64: 16, 3>}, {pipeline_mode = #tpu.pipeline_mode<synchronous>, transform_indices = @transform_8, window_bounds = array<i64: 1, 3>}, {transform_indices = @transform_9, window_bounds = array<i64: 1, 1, 3>}]} {
    %c0 = arith.constant 0 : index
    %c0_0 = arith.constant 0 : index
    %0 = vector.load %arg1[%c0, %c0_0] : memref<8x4xf32, #tpu.memory_space<vmem>>, vector<8x4xf32>
    %c0_1 = arith.constant 0 : index
    %c0_2 = arith.constant 0 : index
    %1 = vector.load %arg2[%c0_1, %c0_2] : memref<4x8xbf16, #tpu.memory_space<vmem>>, vector<4x8xbf16>
    %c0_3 = arith.constant 0 : index
    %c0_4 = arith.constant 0 : index
    %2 = vector.load %arg3[%c0_3, %c0_4] : memref<1x8xf32, #tpu.memory_space<vmem>>, vector<1x8xf32>
    %3 = arith.truncf %0 : vector<8x4xf32> to vector<8x4xbf16>
    %cst = arith.constant dense<0.000000e+00> : vector<8x8xf32>
    %4 = tpu.matmul %3, %1, %cst {dimension_numbers = #tpu.dot_dimension_numbers<[1], [0], [0], [1], [0, 0, 1, 1], [], []>} : vector<8x4xbf16>, vector<4x8xbf16>, vector<8x8xf32> -> vector<8x8xf32>
    %5 = vector.broadcast %2 : vector<1x8xf32> to vector<8x8xf32>
    %6 = arith.addf %4, %5 : vector<8x8xf32>
    %cst_5 = arith.constant 0.000000e+00 : f32
    %7 = vector.broadcast %cst_5 : f32 to vector<8x8xf32>
    %8 = arith.cmpf ogt, %6, %7 : vector<8x8xf32>
    %cst_6 = arith.constant 0.00999999977 : f32
    %9 = vector.broadcast %cst_6 : f32 to vector<8x8xf32>
    %10 = arith.mulf %9, %6 : vector<8x8xf32>
    %11 = arith.select %8, %6, %10 : vector<8x8xi1>, vector<8x8xf32>
    %c0_7 = arith.constant 0 : index
    %c0_8 = arith.constant 0 : index
    %12 = vector.load %arg4[%c0_7, %c0_8] : memref<8x16xbf16, #tpu.memory_space<vmem>>, vector<8x16xbf16>
    %c0_9 = arith.constant 0 : index
    %c0_10 = arith.constant 0 : index
    %13 = vector.load %arg5[%c0_9, %c0_10] : memref<1x16xf32, #tpu.memory_space<vmem>>, vector<1x16xf32>
    %14 = arith.truncf %11 : vector<8x8xf32> to vector<8x8xbf16>
    %cst_11 = arith.constant dense<0.000000e+00> : vector<8x16xf32>
    %15 = tpu.matmul %14, %12, %cst_11 {dimension_numbers = #tpu.dot_dimension_numbers<[1], [0], [0], [1], [0, 0, 1, 1], [], []>} : vector<8x8xbf16>, vector<8x16xbf16>, vector<8x16xf32> -> vector<8x16xf32>
    %16 = vector.broadcast %13 : vector<1x16xf32> to vector<8x16xf32>
    %17 = arith.addf %15, %16 : vector<8x16xf32>
    %cst_12 = arith.constant 0.000000e+00 : f32
    %18 = vector.broadcast %cst_12 : f32 to vector<8x16xf32>
    %19 = arith.cmpf ogt, %17, %18 : vector<8x16xf32>
    %cst_13 = arith.constant 0.00999999977 : f32
    %20 = vector.broadcast %cst_13 : f32 to vector<8x16xf32>
    %21 = arith.mulf %20, %17 : vector<8x16xf32>
    %22 = arith.select %19, %17, %21 : vector<8x16xi1>, vector<8x16xf32>
    %23 = tpu.iota {dimensions = array<i32: 0>} : vector<1x8xi32>
    %24 = tpu.iota {dimensions = array<i32: 1>} : vector<1x8xi32>
    %c8_i32 = arith.constant 8 : i32
    %25 = vector.broadcast %c8_i32 : i32 to vector<1x8xi32>
    %26 = arith.muli %23, %25 : vector<1x8xi32>
    %27 = arith.cmpi sge, %24, %26 : vector<1x8xi32>
    %c1_i32 = arith.constant 1 : i32
    %28 = vector.broadcast %c1_i32 : i32 to vector<1x8xi32>
    %29 = arith.addi %23, %28 : vector<1x8xi32>
    %c8_i32_14 = arith.constant 8 : i32
    %30 = vector.broadcast %c8_i32_14 : i32 to vector<1x8xi32>
    %31 = arith.muli %29, %30 : vector<1x8xi32>
    %32 = arith.cmpi slt, %24, %31 : vector<1x8xi32>
    %33 = arith.andi %27, %32 : vector<1x8xi1>
    %c0_15 = arith.constant 0 : index
    %c0_16 = arith.constant 0 : index
    %34 = vector.load %arg6[%c0_15, %c0_16] : memref<1x8xf32, #tpu.memory_space<vmem>>, vector<1x8xf32>
    %cst_17 = arith.constant 0.000000e+00 : f32
    %35 = vector.broadcast %cst_17 : f32 to vector<1x8xf32>
    %36 = arith.select %33, %34, %35 : vector<1x8xi1>, vector<1x8xf32>
    %cst_18 = arith.constant dense<0.000000e+00> : vector<1x16xf32>
    %37 = tpu.matmul %36, %22, %cst_18 {dimension_numbers = #tpu.dot_dimension_numbers<[1], [0], [0], [1], [0, 0, 1, 1], [], []>} : vector<1x8xf32>, vector<8x16xf32>, vector<1x16xf32> -> vector<1x16xf32>
    %c0_19 = arith.constant 0 : index
    %c0_20 = arith.constant 0 : index
    %38 = memref.load %arg7[%c0_19, %c0_20] : memref<1x1xf32, #tpu.memory_space<smem>>
    %39 = vector.broadcast %38 : f32 to vector<1x16xf32>
    %40 = arith.addf %37, %39 : vector<1x16xf32>
    %cst_21 = arith.constant 0.000000e+00 : f32
    %41 = vector.broadcast %cst_21 : f32 to vector<1x16xf32>
    %42 = arith.maximumf %40, %41 : vector<1x16xf32>
    %c0_22 = arith.constant 0 : index
    %c0_23 = arith.constant 0 : index
    %43 = vector.load %arg8[%c0_22, %c0_23] : memref<16x3xbf16, #tpu.memory_space<vmem>>, vector<16x3xbf16>
    %44 = arith.truncf %42 : vector<1x16xf32> to vector<1x16xbf16>
    %cst_24 = arith.constant dense<0.000000e+00> : vector<1x3xf32>
    %45 = tpu.matmul %44, %43, %cst_24 {dimension_numbers = #tpu.dot_dimension_numbers<[1], [0], [0], [1], [0, 0, 1, 1], [], []>} : vector<1x16xbf16>, vector<16x3xbf16>, vector<1x3xf32> -> vector<1x3xf32>
    %c0_25 = arith.constant 0 : index
    %c0_26 = arith.constant 0 : index
    %46 = vector.load %arg9[%c0_25, %c0_26] : memref<1x3xf32, #tpu.memory_space<vmem>>, vector<1x3xf32>
    %47 = arith.addf %45, %46 : vector<1x3xf32>
    %c0_27 = arith.constant 0 : index
    %c0_28 = arith.constant 0 : index
    %c0_29 = arith.constant 0 : index
    %48 = vector.load %arg10[%c0_27, %c0_28, %c0_29] : memref<1x1x3xf32, #tpu.memory_space<vmem>>, vector<1x1x3xf32>
    %49 = vector.shape_cast %48 : vector<1x1x3xf32> to vector<1x3xf32>
    %50 = vector.shape_cast %47 : vector<1x3xf32> to vector<1x1x3xf32>
    tpu.vector_store %arg10[%c0_27, %c0_28, %c0_29], %50 {strides = array<i32>} : memref<1x1x3xf32, #tpu.memory_space<vmem>>, vector<1x1x3xf32>,
    return
  }
  func.func @transform_0(%arg0: i32) -> (i32, i32) {
    %c0_i32 = arith.constant 0 : i32
    %c0_i32_0 = arith.constant 0 : i32
    return %arg0, %c0_i32 : i32, i32
  }
  func.func @transform_1(%arg0: i32) -> (i32, i32) {
    %c0_i32 = arith.constant 0 : i32
    %c0_i32_0 = arith.constant 0 : i32
    %c0_i32_1 = arith.constant 0 : i32
    return %c0_i32, %c0_i32_0 : i32, i32
  }
  func.func @transform_2(%arg0: i32) -> (i32, i32) {
    %c0_i32 = arith.constant 0 : i32
    %c0_i32_0 = arith.constant 0 : i32
    %c0_i32_1 = arith.constant 0 : i32
    return %c0_i32, %c0_i32_0 : i32, i32
  }
  func.func @transform_3(%arg0: i32) -> (i32, i32) {
    %c0_i32 = arith.constant 0 : i32
    %c0_i32_0 = arith.constant 0 : i32
    %c0_i32_1 = arith.constant 0 : i32
    return %c0_i32, %c0_i32_0 : i32, i32
  }
  func.func @transform_4(%arg0: i32) -> (i32, i32) {
    %c0_i32 = arith.constant 0 : i32
    %c0_i32_0 = arith.constant 0 : i32
    %c0_i32_1 = arith.constant 0 : i32
    return %c0_i32, %c0_i32_0 : i32, i32
  }
  func.func @transform_5(%arg0: i32) -> (i32, i32) {
    %c0_i32 = arith.constant 0 : i32
    %c0_i32_0 = arith.constant 0 : i32
    %c0_i32_1 = arith.constant 0 : i32
    return %c0_i32, %c0_i32_0 : i32, i32
  }
  func.func @transform_6(%arg0: i32) -> (i32, i32) {
    %c0_i32 = arith.constant 0 : i32
    %c0_i32_0 = arith.constant 0 : i32
    %c0_i32_1 = arith.constant 0 : i32
    return %c0_i32, %c0_i32_0 : i32, i32
  }
  func.func @transform_7(%arg0: i32) -> (i32, i32) {
    %c0_i32 = arith.constant 0 : i32
    %c0_i32_0 = arith.constant 0 : i32
    %c0_i32_1 = arith.constant 0 : i32
    return %c0_i32, %c0_i32_0 : i32, i32
  }
  func.func @transform_8(%arg0: i32) -> (i32, i32) {
    %c0_i32 = arith.constant 0 : i32
    %c0_i32_0 = arith.constant 0 : i32
    %c0_i32_1 = arith.constant 0 : i32
    return %c0_i32, %c0_i32_0 : i32, i32
  }
  func.func @transform_9(%arg0: i32) -> (i32, i32, i32) {
    %c0_i32 = arith.constant 0 : i32
    %c0_i32_0 = arith.constant 0 : i32
    %c0_i32_1 = arith.constant 0 : i32
    return %arg0, %c0_i32, %c0_i32_0 : i32, i32, i32
  }
}

</mosaic_0001>

<bundles_post_ra>
// kernel: fcnet2d_forward.1
= control target key start
LH: loop header
LB: loop body
LE: loop exit
PB: predicated region body
PF: predicated region fallthrough
CT: control target
= control target key end

     0   :  { %s994_s0 = inlined_call_operand.vmem [shape: f32[16,4], index: 0, kind: input, shape index: {}]   ;;  %s995_s1 = inlined_call_operand.vmem [shape: bf16[4,8], index: 1, kind: input, shape index: {}]   ;;  %s996_s2 = inlined_call_operand.vmem [shape: f32[1,8], index: 2, kind: input, shape index: {}]   ;;  %s997_s3 = inlined_call_operand.vmem [shape: bf16[8,16], index: 3, kind: input, shape index: {}]   ;;  %s998_s4 = inlined_call_operand.vmem [shape: f32[1,16], index: 4, kind: input, shape index: {}]   ;;  %s999_s5 = inlined_call_operand.vmem [shape: f32[1,8], index: 5, kind: input, shape index: {}]   ;;  %s1000_s6 = inlined_call_operand.<no memory space> [shape: f32[1,1], index: 6, kind: input, shape index: {}]   ;;  %s1001_s7 = inlined_call_operand.vmem [shape: bf16[16,3], index: 7, kind: input, shape index: {}]   ;;  %s1002_s8 = inlined_call_operand.vmem [shape: f32[1,3], index: 8, kind: input, shape index: {}]   ;;  %s1003_s9 = inlined_call_operand.hbm [shape: f32[2,1,3], index: 9, kind: output, shape index: {}]  }
   0x1   :  { %14 = sst [smem:[#allocation2]] %s1000_s6 }
   0x2   :  { %15 = vsyncpa [#allocation4], 0 }
   0x3   :  { %17 = vsyncpa [#allocation4 + $0x1], 0  ;;  %s868_s11 = smov 0   ;;  %s870_s12 = smov 0  }
   0x4   :  { %s872_s13 = smov 0   ;;  %s874_s14 = smov 0  }
   0x5 LB: > { %s889_s6 = sadd.s32 4294967295, %s810_s14   ;;  %s662_s15 = sadd.s32 4294967294, %s810_s14   ;;  %s810_s14 = sphi %s874_s14, %s1009_s14   ;;  %s806_s13 = sphi %s872_s13, %s1008_s13   ;;  %s802_s12 = sphi %s870_s12, %s1007_s12   ;;  %s798_s11 = sphi %s868_s11, %s1006_s11  }
   0x6   : > { %s893_s16 = sadd.s32 1, %s810_s14   ;;  %s224_s17 = sadd.s32 1, %s806_s13 }
   0x7   : > { %s221_s18 = ssub.s32 %s810_s14, %s893_s16  ;;  %p234_p0 = scmp.ne.s32.totalorder %s806_s13, %s802_s12 }
   0x8   : > { %p222_p1 = scmp.eq.s32.totalorder %s221_s18, 0  ;;  %p235_p2 = scmp.eq.s32.totalorder %s889_s6, 1 }
   0x9   : > { %p240_p3 = scmp.ne.s32.totalorder %s802_s12, %s798_s11  ;;  %p241_p4 = scmp.eq.s32.totalorder %s662_s15, 1 }
   0xa   : > { %s904_s19 = scalar_select %p222_p1, %s806_s13, %s224_s17  }
   0xb   : > { %p906_p5 = por %p235_p2, %p234_p0  ;;  %p910_p6 = por %p241_p4, %p240_p3 }
   0xc   : > { %p665_p7 = scmp.ge.s32.totalorder %s810_s14, 1  ;;  %p290_p8 = scmp.lt.s32.totalorder %s810_s14, 3 }
   0xe   : > { %p291_p9 = pnand %p665_p7, %p290_p8 }
   0xf   : > { %p324_p10 = scmp.lt.s32.totalorder (!%p291_p9), %s889_s6, 1  ;;  %s462_s26 = sld [smem:[#allocation2]] (!%p291_p9) }
  0x10   : > { %294 = sbr.rel (%p291_p9) target bundleno = 835 (0x343), region = 56  ;;  %s322_s27 = sand.u32 (!%p291_p9), 1, %s802_s12  }
  0x11   : > { %s674_s30 = sshll.u32 (!%p291_p9), %s889_s6, 4  ;;  %s323_s10 = scalar_lea.vmem (!%p291_p9), [#allocation3], %s322_s27 }
  0x12   : > { %s607_s15 = sshll.u32 (!%p291_p9), %s323_s10, 4  ;;  %s953_s22 = scalar_lea.hbm (!%p291_p9), %s1003_s9, %s674_s30  ;;  %s955_s15 = int_to_ptr.vmem [resolvable:$true] %s607_s15 }
  0x13   : > { %s595_s23 = scalar_lea.sflag (!%p291_p9), [#allocation4], %s322_s27 }
  0x15   : > { %v330_v0 = vld [vmem:[%s995_s1] sm:$0x3]  ;;  %vm343_vm0 = vcmask 1041408   ;;  %v812_v1 = vmov 0.0   ;;  %vm813_vm1 = vmmov 0   ;;  %s325_s24 = scalar_select %p324_p10, %s889_s6, 1  ;;  %v450_v16 = vlaneseq }
  0x16   : > { %685 = vmatprep.subr.bf16.mxu0 %v812_v1  ;;  %v345_v2 = vsel %vm343_vm0, %v330_v0, 0  ;;  %687 = vmatprep.mubr.msk.bf16.mxu0 %vm813_vm1, %v812_v1  ;;  %vm339_vm2 = vcmask 31744   ;;  %v390_v5 = vld [vmem:[%s997_s3] sm:$0xf]  ;;  %vm403_vm3 = vcmask 1043456   ;;  %vm399_vm5 = vcmask 64512  }
  0x17   : > { %686 = vmatpush3.bf16.msra.mxu0 %v345_v2  ;;  %691 = vmatprep.subr.bf16.mxu1 %v812_v1  ;;  %s666_s25 = sshll.u32 %s325_s24, 3  ;;  %v405_v6 = vsel %vm403_vm3, %v390_v5, 0  ;;  %v667_v7 = vld [vmem:[%s996_s2] ss:$0 sm:$0xff]  ;;  %v451_v17 = vshrl.u32 %v450_v16, 7  ;;  %v453_v19 = vand.u32 127, %v450_v16  ;;  %v463_v33 = vstv %s462_s26 }
  0x18   : > { %693 = vmatprep.mubr.msk.bf16.mxu1 %vm813_vm1, %v812_v1  ;;  %697 = vmatprep.subr.mxu0 %v812_v1  ;;  %s327_s28 = scalar_lea.vmem %s994_s0, %s666_s25  ;;  %v669_v22 = vld [vmem:[%s998_s4] ss:$0 sm:$0xff]  ;;  %vm548_vm10 = vcmask 130048   ;;  %vm592_vm11 = vcmask 16384   ;;  %s750_s6 = scalar_lea.vmem %s955_s15, 16 }
  0x19   : > { %v329_v3 = vld [vmem:[%s327_s28] sm:$0xff]  ;;  %692 = vmatpush3.bf16.msra.mxu1 %v405_v6  ;;  %v456_v18 = vadd.s32 1, %v451_v17  ;;  %v454_v20 = vmul.u32 8, %v451_v17  ;;  %p751_p11 = scmp.ne.s32.totalorder %s955_s15, %s750_s6  ;;  %s814_s24 = smov [#allocation3]  }
  0x1a   : > { %v332_v4 = vpack.c.bf16 %v329_v3, %v329_v3  ;;  %702 = vmatprep.subr.bf16.mxu1 %v812_v1  ;;  %v460_v25 = vld [vmem:[%s999_s5] sm:$0x1]  ;;  %s754_s25 = sshll.u32 %s814_s24, 4  ;;  %s755_s25 = int_to_ptr.vmem [resolvable:$false] %s754_s25 }
  0x1b   : > { %v457_v21 = vmul.u32 8, %v456_v18  ;;  %vm455_vm6 = vcmp.ge.s32.totalorder %v453_v19, %v454_v20  ;;  %v749_v32 = vld [vmem:[%s1001_s7] sm:$0xff]   ;;  %p752_p12 = pnand %p751_p11, %p906_p5  ;;  %s756_s26 = scalar_lea.vmem %s755_s25, 32 }
  0x1c   : > { %688 = vmatmul.mubr.msk.bf16.vlgmr.msra.gmra.mxu0 %vm339_vm2, %v332_v4  ;;  %v541_v39 = vld [vmem:[%s1002_s8] sm:$0x1]  ;;  %p757_p0 = scmp.lt.s32.totalorder %s955_s15, %s755_s25  ;;  %p758_p1 = scmp.lt.s32.totalorder %s756_s26, %s750_s6 }
  0x1d   : > { %699 = vmatprep.mubr.msk.f32.mxu0 %vm813_vm1, %v812_v1  ;;  %vm458_vm7 = vcmp.lt.s32.totalorder %v453_v19, %v457_v21  ;;  %p753_p13 = pneg %p752_p12 }
  0x1e   : > { %vm459_vm8 = vmand %vm455_vm6, %vm458_vm7  ;;  %p759_p2 = por %p758_p1, %p757_p0 }
  0x1f   : > { %v461_v29 = vsel %vm459_vm8, %v460_v25, 0.0 }
  0x20   : > { %p760_p3 = pnand %p759_p2, %p753_p13 }
  0xdc   : > { %v381_v8 = vpop.f32.mrf.mxu0 }
  0xdd   : > { %v382_v9 = vadd.f32 %v667_v7, %v381_v8 }
  0xde   : > { %v689_v10 = vpop.f32.mrf.mxu0 }
  0xdf   : > { %vm387_vm4 = vcmp.gt.f32.partialorder %v382_v9, 0.0  ;;  %v388_v11 = vmul.f32 0.01, %v382_v9 }
  0xe0   : > { %v384_v12 = vpop.f32.mrf.mxu0 }
  0xe1   : > { %v389_v13 = vsel %vm387_vm4, %v382_v9, %v388_v11 }
  0xe2   : > { %v392_v14 = vpack.c.bf16 %v389_v13, %v389_v13  ;;  %v690_v15 = vpop.f32.mrf.mxu0 }
  0xe4   : > { %694 = vmatmul.mubr.msk.bf16.vlgmr.msra.gmra.mxu1 %vm399_vm5, %v392_v14 }
  0xe5   : > { %704 = vmatprep.mubr.msk.bf16.mxu1 %vm813_vm1, %v812_v1  ;;  %703 = vmatpush3.bf16.msra.mxu1 %v749_v32 }
 0x1a4   : > { %v441_v23 = vpop.f32.mrf.mxu1 }
 0x1a5   : > { %v442_v24 = vadd.f32 %v669_v22, %v441_v23 }
 0x1a6   : > { %v695_v26 = vpop.f32.mrf.mxu1 }
 0x1a7   : > { %vm447_vm9 = vcmp.gt.f32.partialorder %v442_v24, 0.0  ;;  %v448_v27 = vmul.f32 0.01, %v442_v24 }
 0x1a8   : > { %v444_v28 = vpop.f32.mrf.mxu1 }
 0x1a9   : > { %v449_v30 = vsel %vm447_vm9, %v442_v24, %v448_v27 }
 0x1aa   : > { %v696_v31 = vpop.f32.mrf.mxu1  ;;  %698 = vmatpush3.msra.mxu0 %v449_v30 }
 0x1ab   : > { %700 = vmatmul.mubr.msk.f32.vlgmr.msra.gmra.mxu0 %vm399_vm5, %v461_v29 }
 0x26b   : > { %v533_v34 = vpop.f32.mrf.mxu0 }
 0x26c   : > { %v534_v35 = vadd.f32 %v533_v34, %v463_v33 }
 0x26d   : > { %v701_v36 = vpop.f32.mrf.mxu0 }
 0x26e   : > { %v537_v37 = vmax.f32 %v534_v35, 0.0 }
 0x270   : > { %v540_v38 = vpack.c.bf16 %v537_v37, %v537_v37 }
 0x272   : > { %705 = vmatmul.mubr.msk.bf16.vlgmr.msra.gmra.mxu1 %vm548_vm10, %v540_v38 }
 0x332   : > { %v586_v40 = vpop.f32.mrf.mxu1 }
 0x333   : > { %v587_v41 = vadd.f32 %v586_v40, %v541_v39 }
 0x334   : > { %v706_v42 = vpop.f32.mrf.mxu1 }
 0x335   : > { %593 = vst.msk [vmem:[%s323_s10] sm:$0x1] %vm592_vm11, %v587_v41 }
 0x336   : > { %v589_v43 = vpop.f32.mrf.mxu1 }
 0x337   : > { %763 = shalt.err (!%p760_p3)
}
 0x338   : > { %s764_s28 = scalar_lea.hbm %s953_s22, 16  ;;  %s768_s30 = scalar_lea.hbm %s1003_s9, 32 }
 0x339   : > { %p765_p4 = scmp.ne.s32.totalorder %s953_s22, %s764_s28  ;;  %p769_p9 = scmp.lt.s32.totalorder %s953_s22, %s1003_s9 }
 0x33a   : > { %p770_p10 = scmp.lt.s32.totalorder %s768_s30, %s764_s28 }
 0x33b   : > { %p766_p7 = pnand %p765_p4, %p906_p5 }
 0x33c   : > { %p771_p11 = por %p770_p10, %p769_p9 }
 0x33d   : > { %p767_p8 = pneg %p766_p7 }
 0x33f   : > { %p772_p12 = pnand %p771_p11, %p767_p8 }
 0x341   : > { %775 = shalt.err (!%p772_p12)
}
 0x342   : > { %708 = dma.vmem_to_hbm [thread:$0]  (%p906_p5), %s955_s15, 16, %s953_s22, %s595_s23   ;;  %v707_v44 = vpop.f32.mrf.mxu1 }
 0x343 PF: > { %p714_p13 = scmp.ge.s32.totalorder %s810_s14, 2  ;;  %s619_s18 = sand.u32 1, %s798_s11  }
 0x344   : > { %s620_s6 = scalar_lea.sflag [#allocation4], %s619_s18 }
 0x345   : > { %p711_p0 = pnand %p714_p13, %p910_p6 }
 0x347   : > { %p712_p1 = pneg %p711_p0 }
 0x349   : > { %793 = dma.done.wait (%p712_p1), %s620_s6, 16  }
 0x34a   : > { %795 = vsyncadd (%p712_p1), %s620_s6, 4294967280  ;;  %p20_p2 = scmp.ge.s32.totalorder %s893_s16, 4   ;;  %s1006_s11 = smov %s802_s12 }
 0x34b   : > { %s1007_s12 = smov %s806_s13  ;;  %s1008_s13 = smov %s904_s19 }
 0x34c   : > { %s1009_s14 = smov %s893_s16  ;;  %22 = sbr.rel (!%p20_p2) target bundleno = 5 (0x5), region = 91 }
 0x351   :  { %624 = vsyncpa [#allocation4], 1 }
 0x352   :  { %626 = vsyncpa [#allocation4 + $0x1], 1 }

</bundles_post_ra>
